<compile_context>
chip_gen: v6e
topology: v6e:2x2x1
jax: 0.10.0
libtpu: 0.0.40
codegen_flags: <defaults>
</compile_context>

<pallas_src>
import functools

import jax
import jax.numpy as jnp
from jax.experimental import pallas as pl
from jax.experimental.pallas import tpu as pltpu

_MIB = 1024 * 1024


def _round_up(n, m):
    return ((n + m - 1) // m) * m


# ---------------------------------------------------------------------------
# Kernels
# ---------------------------------------------------------------------------
def _ffn_kernel_resident(x_ref, w1_ref, b1_ref, w2_ref, b2_ref, gamma_ref,
                         beta_ref, o_ref, *, eps):
    """Fully-resident weights; 1-D grid over row tiles."""
    x = x_ref[...]                               # native (possibly bf16) dtype
    # linear1 (+bias) + relu; MXU with f32 accumulate.
    h = jnp.dot(x, w1_ref[...], preferred_element_type=jnp.float32)
    h = jnp.maximum(h + b1_ref[...], 0.0)
    # TODO(synk): dropout is identity at p=0.0 (module default); not implemented.
    # linear2 (+bias); cast activations to the weight dtype so GEMM2 also takes
    # the native MXU path.
    y = jnp.dot(h.astype(w2_ref.dtype), w2_ref[...],
                preferred_element_type=jnp.float32)
    y = y + b2_ref[...]
    # residual add + LayerNorm over last dim, in f32.
    r = x.astype(jnp.float32) + y
    mean = jnp.mean(r, axis=-1, keepdims=True)
    centered = r - mean
    var = jnp.mean(centered * centered, axis=-1, keepdims=True)
    inv = jax.lax.rsqrt(var + eps)               # EUP
    o_ref[...] = (centered * inv * gamma_ref[...] + beta_ref[...]).astype(o_ref.dtype)


def _ffn_kernel_ktiled(x_ref, w1_ref, b1_ref, w2_ref, b2_ref, gamma_ref,
                       beta_ref, o_ref, acc_ref, *, eps):
    """Dff-tiled: grid = (row tiles, Dff tiles); f32 accumulator in scratch."""
    k = pl.program_id(1)

    @pl.when(k == 0)
    def _():
        acc_ref[...] = jnp.zeros_like(acc_ref)

    x = x_ref[...]
    h = jnp.dot(x, w1_ref[...], preferred_element_type=jnp.float32)
    h = jnp.maximum(h + b1_ref[...], 0.0)        # bias+relu per Dff chunk: exact
    acc_ref[...] += jnp.dot(h.astype(w2_ref.dtype), w2_ref[...],
                            preferred_element_type=jnp.float32)

    @pl.when(k == pl.num_programs(1) - 1)
    def _():
        y = acc_ref[...] + b2_ref[...]
        r = x.astype(jnp.float32) + y
        mean = jnp.mean(r, axis=-1, keepdims=True)
        centered = r - mean
        var = jnp.mean(centered * centered, axis=-1, keepdims=True)
        inv = jax.lax.rsqrt(var + eps)
        o_ref[...] = (centered * inv * gamma_ref[...] + beta_ref[...]).astype(o_ref.dtype)


# ---------------------------------------------------------------------------
# Wrapper helpers
# ---------------------------------------------------------------------------
def _device_kind():
    try:
        return jax.devices()[0].device_kind.lower()
    except Exception:
        return ""


def _vmem_capacity_bytes():
    try:
        return int(pltpu.get_tpu_info().vmem_capacity_bytes)
    except Exception:
        return 64 * _MIB if "v7" in _device_kind() else 128 * _MIB


def _default_tm():
    kind = _device_kind()
    # v5e's MXU is 4x128x128: 256-row tiles only inflate f32 intermediates.
    if "v5e" in kind or "v5 lite" in kind or "v5lite" in kind:
        return 128
    return 256


def _select_row_tile(N, tm):
    """>= 2 row tiles (v7x megacore split) and < 8 rows of padding per tile."""
    n_tiles = max(2, pl.cdiv(N, tm))
    tm_eff = _round_up(pl.cdiv(N, n_tiles), 8)
    return min(tm_eff, _round_up(N, 8))


def _select_dff_tile(Dff):
    for tk in (512, 256, 128):
        if Dff % tk == 0:
            return tk
    return Dff


# ---------------------------------------------------------------------------
# Public entry point
# ---------------------------------------------------------------------------
def ffn_layer(tgt, w1, b1, w2, b2, gamma, beta, *, eps=1e-5, tm=None,
              matmul_dtype=None, force_dff_tile=False):
    """FFNLayer.forward_post. tgt: (S, B, D); w1: (D, Dff); w2: (Dff, D)."""
    S, B, D = tgt.shape
    Dff = w1.shape[1]
    N = S * B
    out_dtype = tgt.dtype

    if tm is None:
        tm = _default_tm()

    # Optional one-time cast onto the bf16 MXU path (accumulation stays f32).
    if matmul_dtype is not None:
        x2d = tgt.reshape(N, D).astype(matmul_dtype)
        w1 = w1.astype(matmul_dtype)
        w2 = w2.astype(matmul_dtype)
    else:
        x2d = tgt.reshape(N, D)

    w_isz = jnp.dtype(w1.dtype).itemsize
    x_isz = jnp.dtype(x2d.dtype).itemsize
    o_isz = jnp.dtype(out_dtype).itemsize

    # Row tiling (minimal padding, >= 2 grid steps on the parallel axis).
    tm_eff = _select_row_tile(N, tm)
    n_pad = _round_up(N, tm_eff)
    if n_pad != N:
        x2d = jnp.pad(x2d, ((0, n_pad - N), (0, 0)))
    n_rows = n_pad // tm_eff

    # Bias / LN params as (1, dim) f32 rows -- cast once here, not per tile.
    b1_2d = b1.astype(jnp.float32).reshape(1, Dff)
    b2_2d = b2.astype(jnp.float32).reshape(1, D)
    g_2d = gamma.astype(jnp.float32).reshape(1, D)
    be_2d = beta.astype(jnp.float32).reshape(1, D)

    cap = _vmem_capacity_bytes()
    const_param_bytes = 8 * (Dff + 3 * D) * 4    # (1, .) rows pad to 8 sublanes
    io_bytes = 2 * tm_eff * D * (x_isz + o_isz)  # double-buffered row tiles

    # VMEM footprint if both weight matrices stay resident (single-buffered).
    resident_bytes = (2 * D * Dff * w_isz + io_bytes + const_param_bytes
                      + tm_eff * Dff * 4 + 2 * tm_eff * D * 4)
    use_resident = (not force_dff_tile) and (
        int(resident_bytes * 1.3) <= cap - 16 * _MIB)

    tk = _select_dff_tile(Dff)
    n_k = Dff // tk

    if use_resident:
        vmem_need = resident_bytes
    else:
        vmem_need = (2 * 2 * D * tk * w_isz + io_bytes + const_param_bytes
                     + tm_eff * D * 4 + tm_eff * tk * 4 + 2 * tm_eff * D * 4)
    vmem_limit = int(min(cap - 8 * _MIB, max(32 * _MIB, int(vmem_need * 1.3))))

    # Cost hint for the XLA scheduler around the custom call.
    flops = 4 * n_pad * D * Dff + 12 * n_pad * D
    bytes_accessed = (n_pad * D * (x_isz + o_isz) + 2 * D * Dff * w_isz
                      + (Dff + 3 * D) * 4)
    cost = pl.CostEstimate(flops=int(flops), transcendentals=int(n_pad),
                           bytes_accessed=int(bytes_accessed))

    # TODO(synk): for D < 128 (demo only; real MaskFormer uses D >= 256) the
    # output store is lane-masked; folding rows into lanes would fix that.

    def build(single_buffer):
        def inv(shape, imap):
            # Grid-invariant operand: single VMEM buffer (no pointless 2x).
            if single_buffer:
                return pl.BlockSpec(shape, imap, pipeline_mode=pl.Buffered(1))
            return pl.BlockSpec(shape, imap)

        if use_resident:
            kernel = functools.partial(_ffn_kernel_resident, eps=eps)
            grid = (n_rows,)
            dim_sem = ("parallel",)
            in_specs = [
                pl.BlockSpec((tm_eff, D), lambda i: (i, 0)),     # x row tile
                inv((D, Dff), lambda i: (0, 0)),                 # W1 (resident)
                inv((1, Dff), lambda i: (0, 0)),                 # b1
                inv((Dff, D), lambda i: (0, 0)),                 # W2 (resident)
                inv((1, D), lambda i: (0, 0)),                   # b2
                inv((1, D), lambda i: (0, 0)),                   # gamma
                inv((1, D), lambda i: (0, 0)),                   # beta
            ]
            out_specs = pl.BlockSpec((tm_eff, D), lambda i: (i, 0))
            scratch = []
        else:
            kernel = functools.partial(_ffn_kernel_ktiled, eps=eps)
            grid = (n_rows, n_k)
            dim_sem = ("parallel", "arbitrary")
            in_specs = [
                pl.BlockSpec((tm_eff, D), lambda i, k: (i, 0)),  # x row tile
                pl.BlockSpec((D, tk), lambda i, k: (0, k)),      # W1 chunk
                pl.BlockSpec((1, tk), lambda i, k: (0, k)),      # b1 chunk
                pl.BlockSpec((tk, D), lambda i, k: (k, 0)),      # W2 chunk
                inv((1, D), lambda i, k: (0, 0)),                # b2
                inv((1, D), lambda i, k: (0, 0)),                # gamma
                inv((1, D), lambda i, k: (0, 0)),                # beta
            ]
            out_specs = pl.BlockSpec((tm_eff, D), lambda i, k: (i, 0))
            scratch = [pltpu.VMEM((tm_eff, D), jnp.float32)]
        return kernel, grid, dim_sem, in_specs, out_specs, scratch

    def run(single_buffer):
        kernel, grid, dim_sem, in_specs, out_specs, scratch = build(single_buffer)
        return pl.pallas_call(
            kernel,
            out_shape=jax.ShapeDtypeStruct((n_pad, D), out_dtype),
            grid_spec=pltpu.PrefetchScalarGridSpec(
                num_scalar_prefetch=0,
                grid=grid,
                in_specs=in_specs,
                out_specs=out_specs,
                scratch_shapes=scratch),
            compiler_params=pltpu.CompilerParams(
                dimension_semantics=dim_sem,
                vmem_limit_bytes=vmem_limit),
            cost_estimate=cost,
        )(x2d, w1, b1_2d, w2, b2_2d, g_2d, be_2d)

    try:
        out2d = run(single_buffer=hasattr(pl, "Buffered"))
    except Exception:
        # pipeline_mode=pl.Buffered(1) unsupported on this JAX/Mosaic build.
        out2d = run(single_buffer=False)

    if n_pad != N:
        out2d = out2d[:N]
    return out2d.reshape(S, B, D)


# ---------------------------------------------------------------------------
# Reference + deterministic init
# ---------------------------------------------------------------------------
def _xavier_uniform(key, fan_in, fan_out, dtype=jnp.float32):
    # matches nn.init.xavier_uniform_ (gain=1)
    limit = (6.0 / (fan_in + fan_out)) ** 0.5
    return jax.random.uniform(key, (fan_in, fan_out), dtype,
                              minval=-limit, maxval=limit)


def ffn_reference(tgt, w1, b1, w2, b2, gamma, beta, eps=1e-5):
    h = jnp.maximum(tgt @ w1 + b1, 0.0)
    tgt2 = h @ w2 + b2
    r = tgt + tgt2
    mean = jnp.mean(r, axis=-1, keepdims=True)
    var = jnp.mean((r - mean) ** 2, axis=-1, keepdims=True)
    return (r - mean) * jax.lax.rsqrt(var + eps) * gamma + beta


if __name__ == "__main__":
    # small shapes: seq=8, batch=2, d_model=32, dim_feedforward=64
    S, B, D, DFF = 8, 2, 32, 64

    key = jax.random.PRNGKey(0)
    k_x, k_w1, k_w2 = jax.random.split(key, 3)

    tgt = jax.random.normal(k_x, (S, B, D), jnp.float32)

    # Deterministic parameter init (xavier uniform for weights — matches
    # _reset_parameters which only touches p.dim() > 1; zeros for biases).
    w1 = _xavier_uniform(k_w1, D, DFF)       # stored as (in, out) = W1.T
    b1 = jnp.zeros((DFF,), jnp.float32)
    w2 = _xavier_uniform(k_w2, DFF, D)       # (in, out) = W2.T
    b2 = jnp.zeros((D,), jnp.float32)
    gamma = jnp.ones((D,), jnp.float32)      # LayerNorm weight
    beta = jnp.zeros((D,), jnp.float32)      # LayerNorm bias

    ref = ffn_reference(tgt, w1, b1, w2, b2, gamma, beta)

    # 1) f32 resident-weight path (exact).
    out = jax.block_until_ready(ffn_layer(tgt, w1, b1, w2, b2, gamma, beta))
    assert out.shape == (S, B, D)
    assert jnp.allclose(out, ref, atol=1e-5, rtol=1e-5), \
        f"f32 max abs err {jnp.max(jnp.abs(out - ref))}"

    # 2) bf16 MXU path (mixed precision; looser tolerance by construction).
    out_bf16 = jax.block_until_ready(
        ffn_layer(tgt, w1, b1, w2, b2, gamma, beta, matmul_dtype=jnp.bfloat16))
    assert jnp.allclose(out_bf16, ref, atol=5e-2, rtol=5e-2), \
        f"bf16 max abs err {jnp.max(jnp.abs(out_bf16 - ref))}"

    # 3) Dff-tiled accumulation path (forced; exercised with Dff=256, tk=128).
    DFF2 = 256
    k_w3, k_w4 = jax.random.split(jax.random.PRNGKey(1), 2)
    w1b = _xavier_uniform(k_w3, D, DFF2)
    b1b = jnp.zeros((DFF2,), jnp.float32)
    w2b = _xavier_uniform(k_w4, DFF2, D)
    refb = ffn_reference(tgt, w1b, b1b, w2b, b2, gamma, beta)
    outb = jax.block_until_ready(
        ffn_layer(tgt, w1b, b1b, w2b, b2, gamma, beta, force_dff_tile=True))
    assert jnp.allclose(outb, refb, atol=1e-4, rtol=1e-5), \
        f"ktiled max abs err {jnp.max(jnp.abs(outb - refb))}"

    print("KERNEL_OK")
</pallas_src>

<mosaic_0001>
module attributes {stable_mosaic.version = 11 : i64} {
  func.func @_ffn_kernel_resident(%arg0: i32, %arg1: memref<8x32xf32, #tpu.memory_space<vmem>>, %arg2: memref<32x64xf32, #tpu.memory_space<vmem>>, %arg3: memref<1x64xf32, #tpu.memory_space<vmem>>, %arg4: memref<64x32xf32, #tpu.memory_space<vmem>>, %arg5: memref<1x32xf32, #tpu.memory_space<vmem>>, %arg6: memref<1x32xf32, #tpu.memory_space<vmem>>, %arg7: memref<1x32xf32, #tpu.memory_space<vmem>>, %arg8: memref<8x32xf32, #tpu.memory_space<vmem>>) attributes {dimension_semantics = [#tpu.dimension_semantics<parallel>], iteration_bounds = array<i64: 2>, scalar_prefetch = 0 : i64, scratch_operands = 0 : i64, tpu.core_type = #tpu.core_type<tc>, window_params = [{transform_indices = @transform_0, window_bounds = array<i64: 8, 32>}, {pipeline_mode = #tpu.pipeline_mode<synchronous>, transform_indices = @transform_1, window_bounds = array<i64: 32, 64>}, {pipeline_mode = #tpu.pipeline_mode<synchronous>, transform_indices = @transform_2, window_bounds = array<i64: 1, 64>}, {pipeline_mode = #tpu.pipeline_mode<synchronous>, transform_indices = @transform_3, window_bounds = array<i64: 64, 32>}, {pipeline_mode = #tpu.pipeline_mode<synchronous>, transform_indices = @transform_4, window_bounds = array<i64: 1, 32>}, {pipeline_mode = #tpu.pipeline_mode<synchronous>, transform_indices = @transform_5, window_bounds = array<i64: 1, 32>}, {pipeline_mode = #tpu.pipeline_mode<synchronous>, transform_indices = @transform_6, window_bounds = array<i64: 1, 32>}, {transform_indices = @transform_7, window_bounds = array<i64: 8, 32>}]} {
    %c0 = arith.constant 0 : index
    %c0_0 = arith.constant 0 : index
    %0 = vector.load %arg1[%c0, %c0_0] : memref<8x32xf32, #tpu.memory_space<vmem>>, vector<8x32xf32>
    %c0_1 = arith.constant 0 : index
    %c0_2 = arith.constant 0 : index
    %1 = vector.load %arg2[%c0_1, %c0_2] : memref<32x64xf32, #tpu.memory_space<vmem>>, vector<32x64xf32>
    %cst = arith.constant dense<0.000000e+00> : vector<8x64xf32>
    %2 = tpu.matmul %0, %1, %cst {dimension_numbers = #tpu.dot_dimension_numbers<[1], [0], [0], [1], [0, 0, 1, 1], [], []>} : vector<8x32xf32>, vector<32x64xf32>, vector<8x64xf32> -> vector<8x64xf32>
    %c0_3 = arith.constant 0 : index
    %c0_4 = arith.constant 0 : index
    %3 = vector.load %arg3[%c0_3, %c0_4] : memref<1x64xf32, #tpu.memory_space<vmem>>, vector<1x64xf32>
    %4 = vector.broadcast %3 : vector<1x64xf32> to vector<8x64xf32>
    %5 = arith.addf %2, %4 : vector<8x64xf32>
    %cst_5 = arith.constant 0.000000e+00 : f32
    %6 = vector.broadcast %cst_5 : f32 to vector<8x64xf32>
    %7 = arith.maximumf %5, %6 : vector<8x64xf32>
    %c0_6 = arith.constant 0 : index
    %c0_7 = arith.constant 0 : index
    %8 = vector.load %arg4[%c0_6, %c0_7] : memref<64x32xf32, #tpu.memory_space<vmem>>, vector<64x32xf32>
    %cst_8 = arith.constant dense<0.000000e+00> : vector<8x32xf32>
    %9 = tpu.matmul %7, %8, %cst_8 {dimension_numbers = #tpu.dot_dimension_numbers<[1], [0], [0], [1], [0, 0, 1, 1], [], []>} : vector<8x64xf32>, vector<64x32xf32>, vector<8x32xf32> -> vector<8x32xf32>
    %c0_9 = arith.constant 0 : index
    %c0_10 = arith.constant 0 : index
    %10 = vector.load %arg5[%c0_9, %c0_10] : memref<1x32xf32, #tpu.memory_space<vmem>>, vector<1x32xf32>
    %11 = vector.broadcast %10 : vector<1x32xf32> to vector<8x32xf32>
    %12 = arith.addf %9, %11 : vector<8x32xf32>
    %13 = arith.addf %0, %12 : vector<8x32xf32>
    %cst_11 = arith.constant dense<0.000000e+00> : vector<8xf32>
    %14 = vector.multi_reduction <add>, %13, %cst_11 [1] : vector<8x32xf32> to vector<8xf32>
    %15 = vector.shape_cast %14 : vector<8xf32> to vector<8x1xf32>
    %cst_12 = arith.constant 3.200000e+01 : f32
    %16 = vector.broadcast %cst_12 : f32 to vector<8x1xf32>
    %17 = arith.divf %15, %16 : vector<8x1xf32>
    %18 = vector.broadcast %17 : vector<8x1xf32> to vector<8x32xf32>
    %19 = arith.subf %13, %18 : vector<8x32xf32>
    %20 = arith.mulf %19, %19 : vector<8x32xf32>
    %cst_13 = arith.constant dense<0.000000e+00> : vector<8xf32>
    %21 = vector.multi_reduction <add>, %20, %cst_13 [1] : vector<8x32xf32> to vector<8xf32>
    %22 = vector.shape_cast %21 : vector<8xf32> to vector<8x1xf32>
    %cst_14 = arith.constant 3.200000e+01 : f32
    %23 = vector.broadcast %cst_14 : f32 to vector<8x1xf32>
    %24 = arith.divf %22, %23 : vector<8x1xf32>
    %cst_15 = arith.constant 9.99999974E-6 : f32
    %25 = vector.broadcast %cst_15 : f32 to vector<8x1xf32>
    %26 = arith.addf %24, %25 : vector<8x1xf32>
    %27 = math.rsqrt %26 : vector<8x1xf32>
    %28 = vector.broadcast %27 : vector<8x1xf32> to vector<8x32xf32>
    %29 = arith.mulf %19, %28 : vector<8x32xf32>
    %c0_16 = arith.constant 0 : index
    %c0_17 = arith.constant 0 : index
    %30 = vector.load %arg6[%c0_16, %c0_17] : memref<1x32xf32, #tpu.memory_space<vmem>>, vector<1x32xf32>
    %31 = vector.broadcast %30 : vector<1x32xf32> to vector<8x32xf32>
    %32 = arith.mulf %29, %31 : vector<8x32xf32>
    %c0_18 = arith.constant 0 : index
    %c0_19 = arith.constant 0 : index
    %33 = vector.load %arg7[%c0_18, %c0_19] : memref<1x32xf32, #tpu.memory_space<vmem>>, vector<1x32xf32>
    %34 = vector.broadcast %33 : vector<1x32xf32> to vector<8x32xf32>
    %35 = arith.addf %32, %34 : vector<8x32xf32>
    %c0_20 = arith.constant 0 : index
    %c0_21 = arith.constant 0 : index
    %36 = vector.load %arg8[%c0_20, %c0_21] : memref<8x32xf32, #tpu.memory_space<vmem>>, vector<8x32xf32>
    tpu.vector_store %arg8[%c0_20, %c0_21], %35 {strides = array<i32>} : memref<8x32xf32, #tpu.memory_space<vmem>>, vector<8x32xf32>,
    return
  }
  func.func @transform_0(%arg0: i32) -> (i32, i32) {
    %c0_i32 = arith.constant 0 : i32
    %c0_i32_0 = arith.constant 0 : i32
    return %arg0, %c0_i32 : i32, i32
  }
  func.func @transform_1(%arg0: i32) -> (i32, i32) {
    %c0_i32 = arith.constant 0 : i32
    %c0_i32_0 = arith.constant 0 : i32
    %c0_i32_1 = arith.constant 0 : i32
    return %c0_i32, %c0_i32_0 : i32, i32
  }
  func.func @transform_2(%arg0: i32) -> (i32, i32) {
    %c0_i32 = arith.constant 0 : i32
    %c0_i32_0 = arith.constant 0 : i32
    %c0_i32_1 = arith.constant 0 : i32
    return %c0_i32, %c0_i32_0 : i32, i32
  }
  func.func @transform_3(%arg0: i32) -> (i32, i32) {
    %c0_i32 = arith.constant 0 : i32
    %c0_i32_0 = arith.constant 0 : i32
    %c0_i32_1 = arith.constant 0 : i32
    return %c0_i32, %c0_i32_0 : i32, i32
  }
  func.func @transform_4(%arg0: i32) -> (i32, i32) {
    %c0_i32 = arith.constant 0 : i32
    %c0_i32_0 = arith.constant 0 : i32
    %c0_i32_1 = arith.constant 0 : i32
    return %c0_i32, %c0_i32_0 : i32, i32
  }
  func.func @transform_5(%arg0: i32) -> (i32, i32) {
    %c0_i32 = arith.constant 0 : i32
    %c0_i32_0 = arith.constant 0 : i32
    %c0_i32_1 = arith.constant 0 : i32
    return %c0_i32, %c0_i32_0 : i32, i32
  }
  func.func @transform_6(%arg0: i32) -> (i32, i32) {
    %c0_i32 = arith.constant 0 : i32
    %c0_i32_0 = arith.constant 0 : i32
    %c0_i32_1 = arith.constant 0 : i32
    return %c0_i32, %c0_i32_0 : i32, i32
  }
  func.func @transform_7(%arg0: i32) -> (i32, i32) {
    %c0_i32 = arith.constant 0 : i32
    %c0_i32_0 = arith.constant 0 : i32
    return %arg0, %c0_i32 : i32, i32
  }
}

module attributes {stable_mosaic.version = 11 : i64} {
  func.func @_ffn_kernel_resident(%arg0: i32, %arg1: memref<8x32xf32, #tpu.memory_space<vmem>>, %arg2: memref<32x64xf32, #tpu.memory_space<vmem>>, %arg3: memref<1x64xf32, #tpu.memory_space<vmem>>, %arg4: memref<64x32xf32, #tpu.memory_space<vmem>>, %arg5: memref<1x32xf32, #tpu.memory_space<vmem>>, %arg6: memref<1x32xf32, #tpu.memory_space<vmem>>, %arg7: memref<1x32xf32, #tpu.memory_space<vmem>>, %arg8: memref<8x32xf32, #tpu.memory_space<vmem>>) attributes {dimension_semantics = [#tpu.dimension_semantics<parallel>], iteration_bounds = array<i64: 2>, scalar_prefetch = 0 : i64, scratch_operands = 0 : i64, tpu.core_type = #tpu.core_type<tc>, window_params = [{transform_indices = @transform_0, window_bounds = array<i64: 8, 32>}, {pipeline_mode = #tpu.pipeline_mode<synchronous>, transform_indices = @transform_1, window_bounds = array<i64: 32, 64>}, {pipeline_mode = #tpu.pipeline_mode<synchronous>, transform_indices = @transform_2, window_bounds = array<i64: 1, 64>}, {pipeline_mode = #tpu.pipeline_mode<synchronous>, transform_indices = @transform_3, window_bounds = array<i64: 64, 32>}, {pipeline_mode = #tpu.pipeline_mode<synchronous>, transform_indices = @transform_4, window_bounds = array<i64: 1, 32>}, {pipeline_mode = #tpu.pipeline_mode<synchronous>, transform_indices = @transform_5, window_bounds = array<i64: 1, 32>}, {pipeline_mode = #tpu.pipeline_mode<synchronous>, transform_indices = @transform_6, window_bounds = array<i64: 1, 32>}, {transform_indices = @transform_7, window_bounds = array<i64: 8, 32>}]} {
    %c0 = arith.constant 0 : index
    %c0_0 = arith.constant 0 : index
    %0 = vector.load %arg1[%c0, %c0_0] : memref<8x32xf32, #tpu.memory_space<vmem>>, vector<8x32xf32>
    %c0_1 = arith.constant 0 : index
    %c0_2 = arith.constant 0 : index
    %1 = vector.load %arg2[%c0_1, %c0_2] : memref<32x64xf32, #tpu.memory_space<vmem>>, vector<32x64xf32>
    %cst = arith.constant dense<0.000000e+00> : vector<8x64xf32>
    %2 = tpu.matmul %0, %1, %cst {dimension_numbers = #tpu.dot_dimension_numbers<[1], [0], [0], [1], [0, 0, 1, 1], [], []>} : vector<8x32xf32>, vector<32x64xf32>, vector<8x64xf32> -> vector<8x64xf32>
    %c0_3 = arith.constant 0 : index
    %c0_4 = arith.constant 0 : index
    %3 = vector.load %arg3[%c0_3, %c0_4] : memref<1x64xf32, #tpu.memory_space<vmem>>, vector<1x64xf32>
    %4 = vector.broadcast %3 : vector<1x64xf32> to vector<8x64xf32>
    %5 = arith.addf %2, %4 : vector<8x64xf32>
    %cst_5 = arith.constant 0.000000e+00 : f32
    %6 = vector.broadcast %cst_5 : f32 to vector<8x64xf32>
    %7 = arith.maximumf %5, %6 : vector<8x64xf32>
    %c0_6 = arith.constant 0 : index
    %c0_7 = arith.constant 0 : index
    %8 = vector.load %arg4[%c0_6, %c0_7] : memref<64x32xf32, #tpu.memory_space<vmem>>, vector<64x32xf32>
    %cst_8 = arith.constant dense<0.000000e+00> : vector<8x32xf32>
    %9 = tpu.matmul %7, %8, %cst_8 {dimension_numbers = #tpu.dot_dimension_numbers<[1], [0], [0], [1], [0, 0, 1, 1], [], []>} : vector<8x64xf32>, vector<64x32xf32>, vector<8x32xf32> -> vector<8x32xf32>
    %c0_9 = arith.constant 0 : index
    %c0_10 = arith.constant 0 : index
    %10 = vector.load %arg5[%c0_9, %c0_10] : memref<1x32xf32, #tpu.memory_space<vmem>>, vector<1x32xf32>
    %11 = vector.broadcast %10 : vector<1x32xf32> to vector<8x32xf32>
    %12 = arith.addf %9, %11 : vector<8x32xf32>
    %13 = arith.addf %0, %12 : vector<8x32xf32>
    %cst_11 = arith.constant dense<0.000000e+00> : vector<8xf32>
    %14 = vector.multi_reduction <add>, %13, %cst_11 [1] : vector<8x32xf32> to vector<8xf32>
    %15 = vector.shape_cast %14 : vector<8xf32> to vector<8x1xf32>
    %cst_12 = arith.constant 3.200000e+01 : f32
    %16 = vector.broadcast %cst_12 : f32 to vector<8x1xf32>
    %17 = arith.divf %15, %16 : vector<8x1xf32>
    %18 = vector.broadcast %17 : vector<8x1xf32> to vector<8x32xf32>
    %19 = arith.subf %13, %18 : vector<8x32xf32>
    %20 = arith.mulf %19, %19 : vector<8x32xf32>
    %cst_13 = arith.constant dense<0.000000e+00> : vector<8xf32>
    %21 = vector.multi_reduction <add>, %20, %cst_13 [1] : vector<8x32xf32> to vector<8xf32>
    %22 = vector.shape_cast %21 : vector<8xf32> to vector<8x1xf32>
    %cst_14 = arith.constant 3.200000e+01 : f32
    %23 = vector.broadcast %cst_14 : f32 to vector<8x1xf32>
    %24 = arith.divf %22, %23 : vector<8x1xf32>
    %cst_15 = arith.constant 9.99999974E-6 : f32
    %25 = vector.broadcast %cst_15 : f32 to vector<8x1xf32>
    %26 = arith.addf %24, %25 : vector<8x1xf32>
    %27 = math.rsqrt %26 : vector<8x1xf32>
    %28 = vector.broadcast %27 : vector<8x1xf32> to vector<8x32xf32>
    %29 = arith.mulf %19, %28 : vector<8x32xf32>
    %c0_16 = arith.constant 0 : index
    %c0_17 = arith.constant 0 : index
    %30 = vector.load %arg6[%c0_16, %c0_17] : memref<1x32xf32, #tpu.memory_space<vmem>>, vector<1x32xf32>
    %31 = vector.broadcast %30 : vector<1x32xf32> to vector<8x32xf32>
    %32 = arith.mulf %29, %31 : vector<8x32xf32>
    %c0_18 = arith.constant 0 : index
    %c0_19 = arith.constant 0 : index
    %33 = vector.load %arg7[%c0_18, %c0_19] : memref<1x32xf32, #tpu.memory_space<vmem>>, vector<1x32xf32>
    %34 = vector.broadcast %33 : vector<1x32xf32> to vector<8x32xf32>
    %35 = arith.addf %32, %34 : vector<8x32xf32>
    %c0_20 = arith.constant 0 : index
    %c0_21 = arith.constant 0 : index
    %36 = vector.load %arg8[%c0_20, %c0_21] : memref<8x32xf32, #tpu.memory_space<vmem>>, vector<8x32xf32>
    tpu.vector_store %arg8[%c0_20, %c0_21], %35 {strides = array<i32>} : memref<8x32xf32, #tpu.memory_space<vmem>>, vector<8x32xf32>,
    return
  }
  func.func @transform_0(%arg0: i32) -> (i32, i32) {
    %c0_i32 = arith.constant 0 : i32
    %c0_i32_0 = arith.constant 0 : i32
    return %arg0, %c0_i32 : i32, i32
  }
  func.func @transform_1(%arg0: i32) -> (i32, i32) {
    %c0_i32 = arith.constant 0 : i32
    %c0_i32_0 = arith.constant 0 : i32
    %c0_i32_1 = arith.constant 0 : i32
    return %c0_i32, %c0_i32_0 : i32, i32
  }
  func.func @transform_2(%arg0: i32) -> (i32, i32) {
    %c0_i32 = arith.constant 0 : i32
    %c0_i32_0 = arith.constant 0 : i32
    %c0_i32_1 = arith.constant 0 : i32
    return %c0_i32, %c0_i32_0 : i32, i32
  }
  func.func @transform_3(%arg0: i32) -> (i32, i32) {
    %c0_i32 = arith.constant 0 : i32
    %c0_i32_0 = arith.constant 0 : i32
    %c0_i32_1 = arith.constant 0 : i32
    return %c0_i32, %c0_i32_0 : i32, i32
  }
  func.func @transform_4(%arg0: i32) -> (i32, i32) {
    %c0_i32 = arith.constant 0 : i32
    %c0_i32_0 = arith.constant 0 : i32
    %c0_i32_1 = arith.constant 0 : i32
    return %c0_i32, %c0_i32_0 : i32, i32
  }
  func.func @transform_5(%arg0: i32) -> (i32, i32) {
    %c0_i32 = arith.constant 0 : i32
    %c0_i32_0 = arith.constant 0 : i32
    %c0_i32_1 = arith.constant 0 : i32
    return %c0_i32, %c0_i32_0 : i32, i32
  }
  func.func @transform_6(%arg0: i32) -> (i32, i32) {
    %c0_i32 = arith.constant 0 : i32
    %c0_i32_0 = arith.constant 0 : i32
    %c0_i32_1 = arith.constant 0 : i32
    return %c0_i32, %c0_i32_0 : i32, i32
  }
  func.func @transform_7(%arg0: i32) -> (i32, i32) {
    %c0_i32 = arith.constant 0 : i32
    %c0_i32_0 = arith.constant 0 : i32
    return %arg0, %c0_i32 : i32, i32
  }
}

</mosaic_0001>

<bundles_post_ra>
// kernel: tpu_custom_call.1
= control target key start
LH: loop header
LB: loop body
LE: loop exit
PB: predicated region body
PF: predicated region fallthrough
CT: control target
= control target key end

     0   :  { %12 = vsyncpa [#allocation3], 0  ;;  %s904_s0 = inlined_call_operand.vmem [shape: f32[16,32], index: 0, kind: input, shape index: {}]   ;;  %s905_s1 = inlined_call_operand.vmem [shape: f32[32,64], index: 1, kind: input, shape index: {}]   ;;  %s906_s2 = inlined_call_operand.vmem [shape: f32[1,64], index: 2, kind: input, shape index: {}]   ;;  %s907_s3 = inlined_call_operand.vmem [shape: f32[64,32], index: 3, kind: input, shape index: {}]   ;;  %s908_s4 = inlined_call_operand.vmem [shape: f32[1,32], index: 4, kind: input, shape index: {}]   ;;  %s909_s5 = inlined_call_operand.vmem [shape: f32[1,32], index: 5, kind: input, shape index: {}]   ;;  %s910_s6 = inlined_call_operand.vmem [shape: f32[1,32], index: 6, kind: input, shape index: {}]   ;;  %s911_s7 = inlined_call_operand.hbm [shape: f32[16,32], index: 7, kind: output, shape index: {}]  }
   0x1   :  { %14 = vsyncpa [#allocation3 + $0x1], 0  ;;  %s763_s24 = smov 0   ;;  %s765_s25 = smov 0  }
   0x2   :  { %s767_s26 = smov 0   ;;  %s769_s27 = smov 0  }
   0x3 LB: > { %s784_s28 = sadd.s32 4294967295, %s718_s27   ;;  %s555_s29 = sadd.s32 4294967294, %s718_s27   ;;  %s718_s27 = sphi %s769_s27, %s917_s27   ;;  %s714_s26 = sphi %s767_s26, %s916_s26   ;;  %s710_s25 = sphi %s765_s25, %s915_s25   ;;  %s706_s24 = sphi %s763_s24, %s914_s24  }
   0x4   : > { %s788_s30 = sadd.s32 1, %s718_s27   ;;  %s179_s8 = sadd.s32 1, %s714_s26 }
   0x5   : > { %s176_s9 = ssub.s32 %s718_s27, %s788_s30  ;;  %p189_p0 = scmp.ne.s32.totalorder %s714_s26, %s710_s25 }
   0x6   : > { %p177_p1 = scmp.eq.s32.totalorder %s176_s9, 0  ;;  %p190_p2 = scmp.eq.s32.totalorder %s784_s28, 1 }
   0x7   : > { %p195_p3 = scmp.ne.s32.totalorder %s710_s25, %s706_s24  ;;  %p196_p4 = scmp.eq.s32.totalorder %s555_s29, 1 }
   0x8   : > { %s799_s10 = scalar_select %p177_p1, %s714_s26, %s179_s8  }
   0x9   : > { %p801_p5 = por %p190_p2, %p189_p0  ;;  %p805_p6 = por %p196_p4, %p195_p3 }
   0xa   : > { %p558_p7 = scmp.ge.s32.totalorder %s718_s27, 1  ;;  %p239_p8 = scmp.lt.s32.totalorder %s718_s27, 3 }
   0xc   : > { %p240_p9 = pnand %p558_p7, %p239_p8 }
   0xd   : > { %p270_p10 = scmp.lt.s32.totalorder (!%p240_p9), %s784_s28, 1  ;;  %s267_s18 = sand.u32 (!%p240_p9), 1, %s710_s25  }
   0xe   : > { %243 = sbr.rel (%p240_p9) target bundleno = 743 (0x2e7), region = 48  ;;  %s483_s16 = scalar_lea.sflag (!%p240_p9), [#allocation3], %s267_s18 }
   0xf   : > { %s722_s20 = smov (!%p240_p9), [#allocation2]  }
  0x10   : > { %s662_s21 = sshll.u32 (!%p240_p9), %s722_s20, 4  ;;  %s663_s21 = int_to_ptr.vmem [resolvable:$false] %s662_s21 }
  0x13   : > { %v278_v0 = vld [vmem:[%s905_s1 + $0x18] sm:$0xff]  ;;  %v720_v1 = vmov 0.0   ;;  %v277_v2 = vld [vmem:[%s905_s1 + $0x10] sm:$0xff]  ;;  %vm721_vm0 = vmmov 0   ;;  %s271_s19 = scalar_select %p270_p10, %s784_s28, 1  ;;  %v276_v5 = vld [vmem:[%s905_s1 + $0x8] sm:$0xff] }
  0x14   : > { %585 = vmatprep.subr.mxu0 %v720_v1  ;;  %593 = vmatprep.mubr.msk.f32.mxu0 %vm721_vm0, %v720_v1  ;;  %v368_v3 = vld [vmem:[%s907_s3 + $0x38] sm:$0xff]  ;;  %v367_v4 = vld [vmem:[%s907_s3 + $0x30] sm:$0xff]  ;;  %v366_v6 = vld [vmem:[%s907_s3 + $0x28] sm:$0xff]  ;;  %vm286_vm1 = vcmask 261120   ;;  %vm376_vm2 = vcmask 523264  }
  0x15   : > { %586 = vmatpush3.msra.mxu0 %v278_v0  ;;  %596 = vmatprep.subr.mxu1 %v720_v1  ;;  %s560_s29 = sshll.u32 %s271_s19, 3  ;;  %v275_v7 = vld [vmem:[%s905_s1] sm:$0xff]  ;;  %v364_v10 = vld [vmem:[%s907_s3 + $0x18] sm:$0xff]  ;;  %v363_v11 = vld [vmem:[%s907_s3 + $0x10] sm:$0xff]  ;;  %s559_s19 = sshll.u32 %s267_s18, 3 }
  0x16   : > { %587 = vmatprep.subr.mxu0 %v720_v1  ;;  %597 = vmatpush3.msra.mxu1 %v368_v3  ;;  %s273_s17 = scalar_lea.vmem %s904_s0, %s560_s29  ;;  %v365_v9 = vld [vmem:[%s907_s3 + $0x20] sm:$0xff]  ;;  %v362_v12 = vld [vmem:[%s907_s3 + $0x8] sm:$0xff]  ;;  %s568_s29 = sshll.u32 %s784_s28, 7 }
  0x17   : > { %588 = vmatpush3.msra.mxu0 %v277_v2  ;;  %598 = vmatprep.subr.mxu1 %v720_v1  ;;  %v274_v8 = vld [vmem:[%s273_s17] sm:$0xff]  ;;  %s269_s8 = scalar_lea.vmem [#allocation2], %s559_s19  ;;  %s494_s15 = scalar_lea.hbm %s911_s7, %s568_s29 }
  0x18   : > { %589 = vmatprep.subr.mxu0 %v720_v1  ;;  %599 = vmatpush3.msra.mxu1 %v367_v4  ;;  %v361_v13 = vld [vmem:[%s907_s3] sm:$0xff]  ;;  %s496_s9 = sshll.u32 %s269_s8, 4  ;;  %s664_s28 = scalar_lea.vmem %s663_s21, 256  ;;  %s497_s9 = int_to_ptr.vmem [resolvable:$true] %s496_s9 }
  0x19   : > { %590 = vmatpush3.msra.mxu0 %v276_v5  ;;  %600 = vmatprep.subr.mxu1 %v720_v1  ;;  %v561_v14 = vld [vmem:[%s906_s2] ss:$0 sm:$0xff]  ;;  %s658_s17 = scalar_lea.vmem %s497_s9, 128  ;;  %p665_p0 = scmp.lt.s32.totalorder %s497_s9, %s663_s21 }
  0x1a   : > { %591 = vmatprep.subr.mxu0 %v720_v1  ;;  %601 = vmatpush3.msra.mxu1 %v366_v6  ;;  %v563_v19 = vld [vmem:[%s908_s4] ss:$0 sm:$0xff]  ;;  %p659_p11 = scmp.ne.s32.totalorder %s497_s9, %s658_s17  ;;  %p666_p1 = scmp.lt.s32.totalorder %s664_s28, %s658_s17 }
  0x1b   : > { %592 = vmatpush3.msra.mxu0 %v275_v7  ;;  %602 = vmatprep.subr.mxu1 %v720_v1  ;;  %v565_v34 = vld [vmem:[%s909_s5] ss:$0 sm:$0xff] }
  0x1c   : > { %594 = vmatmul.mubr.msk.f32.vlgmr.msra.gmra.mxu0 %vm286_vm1, %v274_v8  ;;  %603 = vmatpush3.msra.mxu1 %v365_v9  ;;  %v566_v36 = vld [vmem:[%s910_s6] ss:$0 sm:$0xff]  ;;  %p660_p12 = pnand %p659_p11, %p801_p5  ;;  %p667_p2 = por %p666_p1, %p665_p0 }
  0x1d   : > { %604 = vmatprep.subr.mxu1 %v720_v1  ;;  %612 = vmatprep.mubr.msk.f32.mxu1 %vm721_vm0, %v720_v1 }
  0x1e   : > { %605 = vmatpush3.msra.mxu1 %v364_v10  ;;  %p661_p13 = pneg %p660_p12 }
  0x1f   : > { %606 = vmatprep.subr.mxu1 %v720_v1 }
  0x20   : > { %607 = vmatpush3.msra.mxu1 %v363_v11  ;;  %p668_p3 = pnand %p667_p2, %p661_p13 }
  0x21   : > { %608 = vmatprep.subr.mxu1 %v720_v1 }
  0x22   : > { %609 = vmatpush3.msra.mxu1 %v362_v12 }
  0x23   : > { %610 = vmatprep.subr.mxu1 %v720_v1 }
  0x24   : > { %611 = vmatpush3.msra.mxu1 %v361_v13 }
  0xdc   : > { %v356_v15 = vpop.f32.mrf.mxu0 }
  0xdd   : > { %v357_v16 = vadd.f32 %v561_v14, %v356_v15 }
  0xde   : > { %v595_v17 = vpop.f32.mrf.mxu0 }
  0xdf   : > { %v360_v18 = vmax.f32 %v357_v16, 0.0 }
  0xe1   : > { %613 = vmatmul.mubr.msk.f32.vlgmr.msra.gmra.mxu1 %vm376_vm2, %v360_v18 }
 0x1a1   : > { %v446_v20 = vpop.f32.mrf.mxu1 }
 0x1a2   : > { %v447_v21 = vadd.f32 %v563_v19, %v446_v20 }
 0x1a3   : > { %v614_v22 = vpop.f32.mrf.mxu1 }
 0x1a4   : > { %v450_v23 = vadd.f32 %v447_v21, %v274_v8 }
 0x1a6   : > { %v451_v24 = vsel %vm286_vm1, %v450_v23, 0.0 }
 0x1a7   : > { %452 = vadd.xlane.f32.xlu0 %v451_v24 }
 0x230   : > { %v453_v25 = vpop.xlane.xlu0 %452 }
 0x231   : > { %v455_v26 = vmul.f32 0.03125, %v453_v25 }
 0x233   : > { %v456_v27 = vsub.f32 %v450_v23, %v455_v26 }
 0x235   : > { %v457_v28 = vmul.f32 %v456_v27, %v456_v27 }
 0x237   : > { %v458_v29 = vsel %vm286_vm1, %v457_v28, 0.0 }
 0x238   : > { %459 = vadd.xlane.f32.xlu0 %v458_v29 }
 0x2c1   : > { %v460_v30 = vpop.xlane.xlu0 %459 }
 0x2c2   : > { %v461_v31 = vmul.f32 0.03125, %v460_v30 }
 0x2c4   : > { %v462_v32 = vadd.f32 1e-05, %v461_v31 }
 0x2c6   : > { %656 = vrsqrt.f32 %v462_v32 }
 0x2d3   : > { %v657_v33 = vpop.eup %656 }
 0x2d4   : > { %v464_v35 = vmul.f32 %v657_v33, %v456_v27 }
 0x2d6   : > { %v472_v37 = vmul.f32 %v565_v34, %v464_v35 }
 0x2d8   : > { %v480_v38 = vadd.f32 %v566_v36, %v472_v37 }
 0x2da   : > { %481 = vst.msk [vmem:[%s269_s8] sm:$0xff] %vm286_vm1, %v480_v38 }
 0x2db   : > { %671 = shalt.err (!%p668_p3)
}
 0x2dc   : > { %s672_s19 = scalar_lea.hbm %s494_s15, 128  ;;  %s676_s23 = scalar_lea.hbm %s911_s7, 256 }
 0x2dd   : > { %p673_p4 = scmp.ne.s32.totalorder %s494_s15, %s672_s19  ;;  %p677_p9 = scmp.lt.s32.totalorder %s494_s15, %s911_s7 }
 0x2de   : > { %p678_p10 = scmp.lt.s32.totalorder %s676_s23, %s672_s19 }
 0x2df   : > { %p674_p7 = pnand %p673_p4, %p801_p5 }
 0x2e0   : > { %p679_p11 = por %p678_p10, %p677_p9 }
 0x2e1   : > { %p675_p8 = pneg %p674_p7 }
 0x2e3   : > { %p680_p12 = pnand %p679_p11, %p675_p8 }
 0x2e5   : > { %683 = shalt.err (!%p680_p12)
}
 0x2e6   : > { %615 = dma.vmem_to_hbm [thread:$0]  (%p801_p5), %s497_s9, 128, %s494_s15, %s483_s16  }
 0x2e7 PF: > { %p621_p13 = scmp.ge.s32.totalorder %s718_s27, 2  ;;  %s508_s13 = sand.u32 1, %s706_s24  }
 0x2e8   : > { %s509_s14 = scalar_lea.sflag [#allocation3], %s508_s13 }
 0x2e9   : > { %p618_p0 = pnand %p621_p13, %p805_p6 }
 0x2eb   : > { %p619_p1 = pneg %p618_p0 }
 0x2ed   : > { %701 = dma.done.wait (%p619_p1), %s509_s14, 128  }
 0x2ee   : > { %703 = vsyncadd (%p619_p1), %s509_s14, 4294967168  ;;  %p17_p2 = scmp.ge.s32.totalorder %s788_s30, 4   ;;  %s914_s24 = smov %s710_s25 }
 0x2ef   : > { %s915_s25 = smov %s714_s26  ;;  %s916_s26 = smov %s799_s10 }
 0x2f0   : > { %s917_s27 = smov %s788_s30  ;;  %19 = sbr.rel (!%p17_p2) target bundleno = 3 (0x3), region = 83 }
 0x2f5   :  { %514 = vsyncpa [#allocation3], 1 }
 0x2f6   :  { %516 = vsyncpa [#allocation3 + $0x1], 1 }

// kernel: tpu_custom_call.1
= control target key start
LH: loop header
LB: loop body
LE: loop exit
PB: predicated region body
PF: predicated region fallthrough
CT: control target
= control target key end

     0   :  { %12 = vsyncpa [#allocation3], 0  ;;  %s904_s0 = inlined_call_operand.vmem [shape: f32[16,32], index: 0, kind: input, shape index: {}]   ;;  %s905_s1 = inlined_call_operand.vmem [shape: f32[32,64], index: 1, kind: input, shape index: {}]   ;;  %s906_s2 = inlined_call_operand.vmem [shape: f32[1,64], index: 2, kind: input, shape index: {}]   ;;  %s907_s3 = inlined_call_operand.vmem [shape: f32[64,32], index: 3, kind: input, shape index: {}]   ;;  %s908_s4 = inlined_call_operand.vmem [shape: f32[1,32], index: 4, kind: input, shape index: {}]   ;;  %s909_s5 = inlined_call_operand.vmem [shape: f32[1,32], index: 5, kind: input, shape index: {}]   ;;  %s910_s6 = inlined_call_operand.vmem [shape: f32[1,32], index: 6, kind: input, shape index: {}]   ;;  %s911_s7 = inlined_call_operand.hbm [shape: f32[16,32], index: 7, kind: output, shape index: {}]  }
   0x1   :  { %14 = vsyncpa [#allocation3 + $0x1], 0  ;;  %s763_s24 = smov 0   ;;  %s765_s25 = smov 0  }
   0x2   :  { %s767_s26 = smov 0   ;;  %s769_s27 = smov 0  }
   0x3 LB: > { %s784_s28 = sadd.s32 4294967295, %s718_s27   ;;  %s555_s29 = sadd.s32 4294967294, %s718_s27   ;;  %s718_s27 = sphi %s769_s27, %s917_s27   ;;  %s714_s26 = sphi %s767_s26, %s916_s26   ;;  %s710_s25 = sphi %s765_s25, %s915_s25   ;;  %s706_s24 = sphi %s763_s24, %s914_s24  }
   0x4   : > { %s788_s30 = sadd.s32 1, %s718_s27   ;;  %s179_s8 = sadd.s32 1, %s714_s26 }
   0x5   : > { %s176_s9 = ssub.s32 %s718_s27, %s788_s30  ;;  %p189_p0 = scmp.ne.s32.totalorder %s714_s26, %s710_s25 }
   0x6   : > { %p177_p1 = scmp.eq.s32.totalorder %s176_s9, 0  ;;  %p190_p2 = scmp.eq.s32.totalorder %s784_s28, 1 }
   0x7   : > { %p195_p3 = scmp.ne.s32.totalorder %s710_s25, %s706_s24  ;;  %p196_p4 = scmp.eq.s32.totalorder %s555_s29, 1 }
   0x8   : > { %s799_s10 = scalar_select %p177_p1, %s714_s26, %s179_s8  }
   0x9   : > { %p801_p5 = por %p190_p2, %p189_p0  ;;  %p805_p6 = por %p196_p4, %p195_p3 }
   0xa   : > { %p558_p7 = scmp.ge.s32.totalorder %s718_s27, 1  ;;  %p239_p8 = scmp.lt.s32.totalorder %s718_s27, 3 }
   0xc   : > { %p240_p9 = pnand %p558_p7, %p239_p8 }
   0xd   : > { %p270_p10 = scmp.lt.s32.totalorder (!%p240_p9), %s784_s28, 1  ;;  %s267_s18 = sand.u32 (!%p240_p9), 1, %s710_s25  }
   0xe   : > { %243 = sbr.rel (%p240_p9) target bundleno = 743 (0x2e7), region = 48  ;;  %s483_s16 = scalar_lea.sflag (!%p240_p9), [#allocation3], %s267_s18 }
   0xf   : > { %s722_s20 = smov (!%p240_p9), [#allocation2]  }
  0x10   : > { %s662_s21 = sshll.u32 (!%p240_p9), %s722_s20, 4  ;;  %s663_s21 = int_to_ptr.vmem [resolvable:$false] %s662_s21 }
  0x13   : > { %v278_v0 = vld [vmem:[%s905_s1 + $0x18] sm:$0xff]  ;;  %v720_v1 = vmov 0.0   ;;  %v277_v2 = vld [vmem:[%s905_s1 + $0x10] sm:$0xff]  ;;  %vm721_vm0 = vmmov 0   ;;  %s271_s19 = scalar_select %p270_p10, %s784_s28, 1  ;;  %v276_v5 = vld [vmem:[%s905_s1 + $0x8] sm:$0xff] }
  0x14   : > { %585 = vmatprep.subr.mxu0 %v720_v1  ;;  %593 = vmatprep.mubr.msk.f32.mxu0 %vm721_vm0, %v720_v1  ;;  %v368_v3 = vld [vmem:[%s907_s3 + $0x38] sm:$0xff]  ;;  %v367_v4 = vld [vmem:[%s907_s3 + $0x30] sm:$0xff]  ;;  %v366_v6 = vld [vmem:[%s907_s3 + $0x28] sm:$0xff]  ;;  %vm286_vm1 = vcmask 261120   ;;  %vm376_vm2 = vcmask 523264  }
  0x15   : > { %586 = vmatpush3.msra.mxu0 %v278_v0  ;;  %596 = vmatprep.subr.mxu1 %v720_v1  ;;  %s560_s29 = sshll.u32 %s271_s19, 3  ;;  %v275_v7 = vld [vmem:[%s905_s1] sm:$0xff]  ;;  %v364_v10 = vld [vmem:[%s907_s3 + $0x18] sm:$0xff]  ;;  %v363_v11 = vld [vmem:[%s907_s3 + $0x10] sm:$0xff]  ;;  %s559_s19 = sshll.u32 %s267_s18, 3 }
  0x16   : > { %587 = vmatprep.subr.mxu0 %v720_v1  ;;  %597 = vmatpush3.msra.mxu1 %v368_v3  ;;  %s273_s17 = scalar_lea.vmem %s904_s0, %s560_s29  ;;  %v365_v9 = vld [vmem:[%s907_s3 + $0x20] sm:$0xff]  ;;  %v362_v12 = vld [vmem:[%s907_s3 + $0x8] sm:$0xff]  ;;  %s568_s29 = sshll.u32 %s784_s28, 7 }
  0x17   : > { %588 = vmatpush3.msra.mxu0 %v277_v2  ;;  %598 = vmatprep.subr.mxu1 %v720_v1  ;;  %v274_v8 = vld [vmem:[%s273_s17] sm:$0xff]  ;;  %s269_s8 = scalar_lea.vmem [#allocation2], %s559_s19  ;;  %s494_s15 = scalar_lea.hbm %s911_s7, %s568_s29 }
  0x18   : > { %589 = vmatprep.subr.mxu0 %v720_v1  ;;  %599 = vmatpush3.msra.mxu1 %v367_v4  ;;  %v361_v13 = vld [vmem:[%s907_s3] sm:$0xff]  ;;  %s496_s9 = sshll.u32 %s269_s8, 4  ;;  %s664_s28 = scalar_lea.vmem %s663_s21, 256  ;;  %s497_s9 = int_to_ptr.vmem [resolvable:$true] %s496_s9 }
  0x19   : > { %590 = vmatpush3.msra.mxu0 %v276_v5  ;;  %600 = vmatprep.subr.mxu1 %v720_v1  ;;  %v561_v14 = vld [vmem:[%s906_s2] ss:$0 sm:$0xff]  ;;  %s658_s17 = scalar_lea.vmem %s497_s9, 128  ;;  %p665_p0 = scmp.lt.s32.totalorder %s497_s9, %s663_s21 }
  0x1a   : > { %591 = vmatprep.subr.mxu0 %v720_v1  ;;  %601 = vmatpush3.msra.mxu1 %v366_v6  ;;  %v563_v19 = vld [vmem:[%s908_s4] ss:$0 sm:$0xff]  ;;  %p659_p11 = scmp.ne.s32.totalorder %s497_s9, %s658_s17  ;;  %p666_p1 = scmp.lt.s32.totalorder %s664_s28, %s658_s17 }
  0x1b   : > { %592 = vmatpush3.msra.mxu0 %v275_v7  ;;  %602 = vmatprep.subr.mxu1 %v720_v1  ;;  %v565_v34 = vld [vmem:[%s909_s5] ss:$0 sm:$0xff] }
  0x1c   : > { %594 = vmatmul.mubr.msk.f32.vlgmr.msra.gmra.mxu0 %vm286_vm1, %v274_v8  ;;  %603 = vmatpush3.msra.mxu1 %v365_v9  ;;  %v566_v36 = vld [vmem:[%s910_s6] ss:$0 sm:$0xff]  ;;  %p660_p12 = pnand %p659_p11, %p801_p5  ;;  %p667_p2 = por %p666_p1, %p665_p0 }
  0x1d   : > { %604 = vmatprep.subr.mxu1 %v720_v1  ;;  %612 = vmatprep.mubr.msk.f32.mxu1 %vm721_vm0, %v720_v1 }
  0x1e   : > { %605 = vmatpush3.msra.mxu1 %v364_v10  ;;  %p661_p13 = pneg %p660_p12 }
  0x1f   : > { %606 = vmatprep.subr.mxu1 %v720_v1 }
  0x20   : > { %607 = vmatpush3.msra.mxu1 %v363_v11  ;;  %p668_p3 = pnand %p667_p2, %p661_p13 }
  0x21   : > { %608 = vmatprep.subr.mxu1 %v720_v1 }
  0x22   : > { %609 = vmatpush3.msra.mxu1 %v362_v12 }
  0x23   : > { %610 = vmatprep.subr.mxu1 %v720_v1 }
  0x24   : > { %611 = vmatpush3.msra.mxu1 %v361_v13 }
  0xdc   : > { %v356_v15 = vpop.f32.mrf.mxu0 }
  0xdd   : > { %v357_v16 = vadd.f32 %v561_v14, %v356_v15 }
  0xde   : > { %v595_v17 = vpop.f32.mrf.mxu0 }
  0xdf   : > { %v360_v18 = vmax.f32 %v357_v16, 0.0 }
  0xe1   : > { %613 = vmatmul.mubr.msk.f32.vlgmr.msra.gmra.mxu1 %vm376_vm2, %v360_v18 }
 0x1a1   : > { %v446_v20 = vpop.f32.mrf.mxu1 }
 0x1a2   : > { %v447_v21 = vadd.f32 %v563_v19, %v446_v20 }
 0x1a3   : > { %v614_v22 = vpop.f32.mrf.mxu1 }
 0x1a4   : > { %v450_v23 = vadd.f32 %v447_v21, %v274_v8 }
 0x1a6   : > { %v451_v24 = vsel %vm286_vm1, %v450_v23, 0.0 }
 0x1a7   : > { %452 = vadd.xlane.f32.xlu0 %v451_v24 }
 0x230   : > { %v453_v25 = vpop.xlane.xlu0 %452 }
 0x231   : > { %v455_v26 = vmul.f32 0.03125, %v453_v25 }
 0x233   : > { %v456_v27 = vsub.f32 %v450_v23, %v455_v26 }
 0x235   : > { %v457_v28 = vmul.f32 %v456_v27, %v456_v27 }
 0x237   : > { %v458_v29 = vsel %vm286_vm1, %v457_v28, 0.0 }
 0x238   : > { %459 = vadd.xlane.f32.xlu0 %v458_v29 }
 0x2c1   : > { %v460_v30 = vpop.xlane.xlu0 %459 }
 0x2c2   : > { %v461_v31 = vmul.f32 0.03125, %v460_v30 }
 0x2c4   : > { %v462_v32 = vadd.f32 1e-05, %v461_v31 }
 0x2c6   : > { %656 = vrsqrt.f32 %v462_v32 }
 0x2d3   : > { %v657_v33 = vpop.eup %656 }
 0x2d4   : > { %v464_v35 = vmul.f32 %v657_v33, %v456_v27 }
 0x2d6   : > { %v472_v37 = vmul.f32 %v565_v34, %v464_v35 }
 0x2d8   : > { %v480_v38 = vadd.f32 %v566_v36, %v472_v37 }
 0x2da   : > { %481 = vst.msk [vmem:[%s269_s8] sm:$0xff] %vm286_vm1, %v480_v38 }
 0x2db   : > { %671 = shalt.err (!%p668_p3)
}
 0x2dc   : > { %s672_s19 = scalar_lea.hbm %s494_s15, 128  ;;  %s676_s23 = scalar_lea.hbm %s911_s7, 256 }
 0x2dd   : > { %p673_p4 = scmp.ne.s32.totalorder %s494_s15, %s672_s19  ;;  %p677_p9 = scmp.lt.s32.totalorder %s494_s15, %s911_s7 }
 0x2de   : > { %p678_p10 = scmp.lt.s32.totalorder %s676_s23, %s672_s19 }
 0x2df   : > { %p674_p7 = pnand %p673_p4, %p801_p5 }
 0x2e0   : > { %p679_p11 = por %p678_p10, %p677_p9 }
 0x2e1   : > { %p675_p8 = pneg %p674_p7 }
 0x2e3   : > { %p680_p12 = pnand %p679_p11, %p675_p8 }
 0x2e5   : > { %683 = shalt.err (!%p680_p12)
}
 0x2e6   : > { %615 = dma.vmem_to_hbm [thread:$0]  (%p801_p5), %s497_s9, 128, %s494_s15, %s483_s16  }
 0x2e7 PF: > { %p621_p13 = scmp.ge.s32.totalorder %s718_s27, 2  ;;  %s508_s13 = sand.u32 1, %s706_s24  }
 0x2e8   : > { %s509_s14 = scalar_lea.sflag [#allocation3], %s508_s13 }
 0x2e9   : > { %p618_p0 = pnand %p621_p13, %p805_p6 }
 0x2eb   : > { %p619_p1 = pneg %p618_p0 }
 0x2ed   : > { %701 = dma.done.wait (%p619_p1), %s509_s14, 128  }
 0x2ee   : > { %703 = vsyncadd (%p619_p1), %s509_s14, 4294967168  ;;  %p17_p2 = scmp.ge.s32.totalorder %s788_s30, 4   ;;  %s914_s24 = smov %s710_s25 }
 0x2ef   : > { %s915_s25 = smov %s714_s26  ;;  %s916_s26 = smov %s799_s10 }
 0x2f0   : > { %s917_s27 = smov %s788_s30  ;;  %19 = sbr.rel (!%p17_p2) target bundleno = 3 (0x3), region = 83 }
 0x2f5   :  { %514 = vsyncpa [#allocation3], 1 }
 0x2f6   :  { %516 = vsyncpa [#allocation3 + $0x1], 1 }

</bundles_post_ra>
